<compile_context>
chip_gen: v7x
topology: tpu7x:2x2x1
jax: 0.10.0
libtpu: 0.0.40
codegen_flags: <defaults>
</compile_context>

<pallas_src>
import functools

import jax
import jax.numpy as jnp
from jax.experimental import pallas as pl
from jax.experimental.pallas import tpu as pltpu

EPS = 1e-07
NUM_CLASSES = 2
LANES = 128
SUBLANES = 8
NC = 2  # leading "parallel" grid axis -> both TensorCores on v7x, harmless elsewhere


def _round_up(x, m):
    return (x + m - 1) // m * m


def f1_loss_kernel(diff_ref, lab_ref, out_ref):
    """Accumulate per-lane partial statistics into the resident output block.

    out_ref rows [ 0: 8) : sum of p1            (per sublane/lane)
            rows [ 8:16) : sum of mask1 * p1
            rows [16:24) : sum of mask1
    """
    i = pl.program_id(1)

    @pl.when(i == 0)
    def _init():
        out_ref[...] = jnp.zeros_like(out_ref)

    diff = diff_ref[...]                                  # (BR, 128) f32
    # Binary softmax prob of class 1 == sigmoid(z1 - z0), via tanh on the EUP.
    p1 = 0.5 * jnp.tanh(0.5 * diff) + 0.5
    m1 = (lab_ref[...] == 1).astype(jnp.float32)          # (BR, 128)

    rb = p1.shape[0] // SUBLANES
    p3 = p1.reshape(rb, SUBLANES, LANES)
    m3 = m1.reshape(rb, SUBLANES, LANES)

    # Pure VALU vreg adds (no per-step XLU cross-lane reduction, no scalar RMW).
    out_ref[0:8, :] += jnp.sum(p3, axis=0)
    out_ref[8:16, :] += jnp.sum(m3 * p3, axis=0)
    out_ref[16:24, :] += jnp.sum(m3, axis=0)


@functools.partial(jax.jit, static_argnames=("block_rows",))
def f1_loss(y_pred, y_true, *, block_rows=4096):
    assert y_pred.ndim == 2
    assert y_true.ndim == 1
    n, c = y_pred.shape
    assert c == NUM_CLASSES

    # Wrapper-side fusion: only the logit difference is needed by the kernel.
    diff = (y_pred[:, 1] - y_pred[:, 0]).astype(jnp.float32)   # (n,)
    labels = y_true.astype(jnp.int32)                          # (n,)

    # Lane/sublane-dense layout: (NC cores, rows_per_core, 128 lanes).
    rows = _round_up(n, LANES) // LANES
    rows_pc = _round_up(rows, NC) // NC
    br = _round_up(max(1, min(block_rows, rows_pc)), SUBLANES)
    rows_pc = _round_up(rows_pc, br)
    grid_n = rows_pc // br
    n_pad = NC * rows_pc * LANES

    # Pad: diff -> very negative (p1 == 0 exactly), labels -> 0 (mask1 == 0).
    diff = jnp.pad(diff, (0, n_pad - n), constant_values=-1e4)
    labels = jnp.pad(labels, (0, n_pad - n), constant_values=0)
    diff = diff.reshape(NC, rows_pc, LANES)
    labels = labels.reshape(NC, rows_pc, LANES)

    block_bytes = br * LANES * 4
    vmem_limit = min(32 * 1024 * 1024, 2 * 2 * block_bytes + (8 << 20))

    stats = pl.pallas_call(
        f1_loss_kernel,
        out_shape=jax.ShapeDtypeStruct((NC, 3 * SUBLANES, LANES), jnp.float32),
        grid=(NC, grid_n),
        in_specs=[
            pl.BlockSpec((None, br, LANES), lambda c, i: (c, i, 0)),
            pl.BlockSpec((None, br, LANES), lambda c, i: (c, i, 0)),
        ],
        out_specs=pl.BlockSpec((None, 3 * SUBLANES, LANES), lambda c, i: (c, 0, 0)),
        compiler_params=pltpu.CompilerParams(
            dimension_semantics=("parallel", "arbitrary"),
            vmem_limit_bytes=vmem_limit,
        ),
        cost_estimate=pl.CostEstimate(
            flops=12 * n_pad,
            transcendentals=n_pad,
            bytes_accessed=8 * n_pad + NC * 3 * SUBLANES * LANES * 4,
        ),
    )(diff, labels)

    # Cross-core + cross-lane reduction and the tiny F1 finalize (XLA-fused).
    sums = stats.reshape(NC, 3, SUBLANES, LANES).sum(axis=(0, 2, 3))  # (3,)
    s_p1, s_tp1, s_c1 = sums[0], sums[1], sums[2]

    tp1 = s_tp1                 # sum_{label==1} p1
    fp1 = s_p1 - s_tp1          # sum_{label==0} p1   (padded p1 == 0)
    c1 = s_c1                   # count(label==1)
    c0 = float(n) - c1          # count(label==0), true n (trace-time int)
    tp0 = c0 - fp1              # sum_{label==0} p0
    fp0 = c1 - tp1              # sum_{label==1} p0
    ntp0 = tp1                  # sum_{label==1} (1 - p0)
    ntp1 = tp0                  # sum_{label==0} (1 - p1)

    def class_f1(tp, fp, ntp):
        nfn = fp  # reference computes nfn identically to fp (quirk preserved)
        n_recall = ntp / (ntp + nfn + EPS)
        precision = tp / (tp + fp + EPS)
        f1 = 2.0 * (precision * n_recall) / (precision + n_recall + EPS)
        return jnp.clip(f1, EPS, 1.0 - EPS)

    return 1.0 - 0.5 * (class_f1(tp0, fp0, ntp0) + class_f1(tp1, fp1, ntp1))


def f1_loss_ref(y_pred, y_true):
    # Pure-JAX reference mirroring the PyTorch module.
    y_true_oh = jax.nn.one_hot(y_true, NUM_CLASSES, dtype=jnp.float32)
    p = jax.nn.softmax(y_pred.astype(jnp.float32), axis=1)
    tp = jnp.sum(y_true_oh * p, axis=0)
    ntp = jnp.sum((1 - y_true_oh) * (1 - p), axis=0)
    fp = jnp.sum((1 - y_true_oh) * p, axis=0)
    nfn = fp
    n_recall = ntp / (ntp + nfn + EPS)
    precision = tp / (tp + fp + EPS)
    f1 = 2 * precision * n_recall / (precision + n_recall + EPS)
    f1 = jnp.clip(f1, EPS, 1 - EPS)
    return 1 - jnp.mean(f1)


if __name__ == "__main__":
    key = jax.random.PRNGKey(0)
    k1, k2, k3, k4 = jax.random.split(key, 4)

    # Small shapes consistent with the module: (batch, 2) logits + int labels.
    n_small = 16
    y_pred = jax.random.normal(k1, (n_small, NUM_CLASSES), dtype=jnp.float32)
    y_true = jax.random.randint(k2, (n_small,), 0, NUM_CLASSES, dtype=jnp.int32)
    loss = jax.block_until_ready(f1_loss(y_pred, y_true))
    ref = jax.block_until_ready(f1_loss_ref(y_pred, y_true))
    assert jnp.allclose(loss, ref, atol=1e-4, rtol=1e-4), (loss, ref)

    # Also exercise the multi-step accumulator path and the core-axis switch.
    n_big = 5000
    y_pred_b = jax.random.normal(k3, (n_big, NUM_CLASSES), dtype=jnp.float32)
    y_true_b = jax.random.randint(k4, (n_big,), 0, NUM_CLASSES, dtype=jnp.int32)
    loss_b = jax.block_until_ready(f1_loss(y_pred_b, y_true_b, block_rows=8))
    ref_b = jax.block_until_ready(f1_loss_ref(y_pred_b, y_true_b))
    assert jnp.allclose(loss_b, ref_b, atol=1e-4, rtol=1e-4), (loss_b, ref_b)

    print("KERNEL_OK")
</pallas_src>

<mosaic_0001>
module attributes {stable_mosaic.version = 11 : i64} {
  func.func @f1_loss_kernel(%arg0: i32, %arg1: i32, %arg2: memref<1x8x128xf32, #tpu.memory_space<vmem>>, %arg3: memref<1x8x128xi32, #tpu.memory_space<vmem>>, %arg4: memref<1x24x128xf32, #tpu.memory_space<vmem>>) attributes {dimension_semantics = [#tpu.dimension_semantics<parallel>, #tpu.dimension_semantics<arbitrary>], iteration_bounds = array<i64: 2, 1>, scalar_prefetch = 0 : i64, scratch_operands = 0 : i64, tpu.core_type = #tpu.core_type<tc>, window_params = [{transform_indices = @transform_0, window_bounds = array<i64: 1, 8, 128>}, {transform_indices = @transform_1, window_bounds = array<i64: 1, 8, 128>}, {transform_indices = @transform_2, window_bounds = array<i64: 1, 24, 128>}]} {
    %c0_i32 = arith.constant 0 : i32
    %0 = arith.cmpi eq, %arg1, %c0_i32 : i32
    %1 = arith.extui %0 : i1 to i32
    %c0_i32_0 = arith.constant 0 : i32
    %2 = arith.cmpi ne, %1, %c0_i32_0 : i32
    scf.if %2 {
      %cst_27 = arith.constant 0.000000e+00 : f32
      %42 = vector.broadcast %cst_27 : f32 to vector<24x128xf32>
      %c0_28 = arith.constant 0 : index
      %c0_29 = arith.constant 0 : index
      %c0_30 = arith.constant 0 : index
      %43 = vector.load %arg4[%c0_28, %c0_29, %c0_30] : memref<1x24x128xf32, #tpu.memory_space<vmem>>, vector<1x24x128xf32>
      %44 = vector.shape_cast %43 : vector<1x24x128xf32> to vector<24x128xf32>
      %45 = vector.shape_cast %42 : vector<24x128xf32> to vector<1x24x128xf32>
      tpu.vector_store %arg4[%c0_28, %c0_29, %c0_30], %45 {strides = array<i32>} : memref<1x24x128xf32, #tpu.memory_space<vmem>>, vector<1x24x128xf32>,
    } else {
    }
    %c0 = arith.constant 0 : index
    %c0_1 = arith.constant 0 : index
    %c0_2 = arith.constant 0 : index
    %3 = vector.load %arg2[%c0, %c0_1, %c0_2] : memref<1x8x128xf32, #tpu.memory_space<vmem>>, vector<1x8x128xf32>
    %4 = vector.shape_cast %3 : vector<1x8x128xf32> to vector<8x128xf32>
    %cst = arith.constant 5.000000e-01 : f32
    %5 = vector.broadcast %cst : f32 to vector<8x128xf32>
    %6 = arith.mulf %5, %4 : vector<8x128xf32>
    %7 = math.tanh %6 : vector<8x128xf32>
    %cst_3 = arith.constant 5.000000e-01 : f32
    %8 = vector.broadcast %cst_3 : f32 to vector<8x128xf32>
    %9 = arith.mulf %8, %7 : vector<8x128xf32>
    %cst_4 = arith.constant 5.000000e-01 : f32
    %10 = vector.broadcast %cst_4 : f32 to vector<8x128xf32>
    %11 = arith.addf %9, %10 : vector<8x128xf32>
    %c0_5 = arith.constant 0 : index
    %c0_6 = arith.constant 0 : index
    %c0_7 = arith.constant 0 : index
    %12 = vector.load %arg3[%c0_5, %c0_6, %c0_7] : memref<1x8x128xi32, #tpu.memory_space<vmem>>, vector<1x8x128xi32>
    %13 = vector.shape_cast %12 : vector<1x8x128xi32> to vector<8x128xi32>
    %c1_i32 = arith.constant 1 : i32
    %14 = vector.broadcast %c1_i32 : i32 to vector<8x128xi32>
    %15 = arith.cmpi eq, %13, %14 : vector<8x128xi32>
    %16 = arith.extui %15 : vector<8x128xi1> to vector<8x128xi32>
    %17 = arith.sitofp %16 : vector<8x128xi32> to vector<8x128xf32>
    %18 = vector.shape_cast %11 : vector<8x128xf32> to vector<1x8x128xf32>
    %19 = vector.shape_cast %17 : vector<8x128xf32> to vector<1x8x128xf32>
    %c0_8 = arith.constant 0 : index
    %c0_9 = arith.constant 0 : index
    %c0_10 = arith.constant 0 : index
    %20 = vector.load %arg4[%c0_8, %c0_9, %c0_10] : memref<1x24x128xf32, #tpu.memory_space<vmem>>, vector<1x8x128xf32>
    %21 = vector.shape_cast %20 : vector<1x8x128xf32> to vector<8x128xf32>
    %cst_11 = arith.constant dense<0.000000e+00> : vector<8x128xf32>
    %22 = vector.multi_reduction <add>, %18, %cst_11 [0] : vector<1x8x128xf32> to vector<8x128xf32>
    %23 = arith.addf %21, %22 : vector<8x128xf32>
    %c0_12 = arith.constant 0 : index
    %c0_13 = arith.constant 0 : index
    %c0_14 = arith.constant 0 : index
    %24 = vector.load %arg4[%c0_12, %c0_13, %c0_14] : memref<1x24x128xf32, #tpu.memory_space<vmem>>, vector<1x8x128xf32>
    %25 = vector.shape_cast %24 : vector<1x8x128xf32> to vector<8x128xf32>
    %26 = vector.shape_cast %23 : vector<8x128xf32> to vector<1x8x128xf32>
    tpu.vector_store %arg4[%c0_12, %c0_13, %c0_14], %26 {strides = array<i32>} : memref<1x24x128xf32, #tpu.memory_space<vmem>>, vector<1x8x128xf32>,
    %c0_15 = arith.constant 0 : index
    %c8 = arith.constant 8 : index
    %c0_16 = arith.constant 0 : index
    %27 = vector.load %arg4[%c0_15, %c8, %c0_16] : memref<1x24x128xf32, #tpu.memory_space<vmem>>, vector<1x8x128xf32>
    %28 = vector.shape_cast %27 : vector<1x8x128xf32> to vector<8x128xf32>
    %29 = arith.mulf %19, %18 : vector<1x8x128xf32>
    %cst_17 = arith.constant dense<0.000000e+00> : vector<8x128xf32>
    %30 = vector.multi_reduction <add>, %29, %cst_17 [0] : vector<1x8x128xf32> to vector<8x128xf32>
    %31 = arith.addf %28, %30 : vector<8x128xf32>
    %c0_18 = arith.constant 0 : index
    %c8_19 = arith.constant 8 : index
    %c0_20 = arith.constant 0 : index
    %32 = vector.load %arg4[%c0_18, %c8_19, %c0_20] : memref<1x24x128xf32, #tpu.memory_space<vmem>>, vector<1x8x128xf32>
    %33 = vector.shape_cast %32 : vector<1x8x128xf32> to vector<8x128xf32>
    %34 = vector.shape_cast %31 : vector<8x128xf32> to vector<1x8x128xf32>
    tpu.vector_store %arg4[%c0_18, %c8_19, %c0_20], %34 {strides = array<i32>} : memref<1x24x128xf32, #tpu.memory_space<vmem>>, vector<1x8x128xf32>,
    %c0_21 = arith.constant 0 : index
    %c16 = arith.constant 16 : index
    %c0_22 = arith.constant 0 : index
    %35 = vector.load %arg4[%c0_21, %c16, %c0_22] : memref<1x24x128xf32, #tpu.memory_space<vmem>>, vector<1x8x128xf32>
    %36 = vector.shape_cast %35 : vector<1x8x128xf32> to vector<8x128xf32>
    %cst_23 = arith.constant dense<0.000000e+00> : vector<8x128xf32>
    %37 = vector.multi_reduction <add>, %19, %cst_23 [0] : vector<1x8x128xf32> to vector<8x128xf32>
    %38 = arith.addf %36, %37 : vector<8x128xf32>
    %c0_24 = arith.constant 0 : index
    %c16_25 = arith.constant 16 : index
    %c0_26 = arith.constant 0 : index
    %39 = vector.load %arg4[%c0_24, %c16_25, %c0_26] : memref<1x24x128xf32, #tpu.memory_space<vmem>>, vector<1x8x128xf32>
    %40 = vector.shape_cast %39 : vector<1x8x128xf32> to vector<8x128xf32>
    %41 = vector.shape_cast %38 : vector<8x128xf32> to vector<1x8x128xf32>
    tpu.vector_store %arg4[%c0_24, %c16_25, %c0_26], %41 {strides = array<i32>} : memref<1x24x128xf32, #tpu.memory_space<vmem>>, vector<1x8x128xf32>,
    return
  }
  func.func @transform_0(%arg0: i32, %arg1: i32) -> (i32, i32, i32) {
    %c0_i32 = arith.constant 0 : i32
    %c0_i32_0 = arith.constant 0 : i32
    return %arg0, %arg1, %c0_i32 : i32, i32, i32
  }
  func.func @transform_1(%arg0: i32, %arg1: i32) -> (i32, i32, i32) {
    %c0_i32 = arith.constant 0 : i32
    %c0_i32_0 = arith.constant 0 : i32
    return %arg0, %arg1, %c0_i32 : i32, i32, i32
  }
  func.func @transform_2(%arg0: i32, %arg1: i32) -> (i32, i32, i32) {
    %c0_i32 = arith.constant 0 : i32
    %c0_i32_0 = arith.constant 0 : i32
    %c0_i32_1 = arith.constant 0 : i32
    return %arg0, %c0_i32, %c0_i32_0 : i32, i32, i32
  }
}

</mosaic_0001>

<bundles_post_ra>
// kernel: f1_loss.1
= control target key start
LH: loop header
LB: loop body
LE: loop exit
PB: predicated region body
PF: predicated region fallthrough
CT: control target
= control target key end

     0   :  { %s381_s9 = smov 0   ;;  %s383_s10 = smov 0   ;;  %s414_s0 = inlined_call_operand.vmem [shape: f32[2,8,128], index: 0, kind: input, shape index: {}]   ;;  %s415_s1 = inlined_call_operand.vmem [shape: s32[2,8,128], index: 1, kind: input, shape index: {}]   ;;  %s416_s2 = inlined_call_operand.vmem [shape: f32[2,24,128], index: 2, kind: output, shape index: {}]  }
   0x1   :  { %s385_s11 = smov 0  }
   0x2 LB: > { %s24_s12 = sadd.s32 1, %s359_s10  ;;  %p306_p0 = scmp.ge.s32.totalorder %s363_s11, 1  ;;  %s363_s11 = sphi %s385_s11, %s12_s11   ;;  %s359_s10 = sphi %s383_s10, %s418_s10   ;;  %s355_s9 = sphi %s381_s9, %s417_s9  }
   0x3   : > { %p26_p1 = scmp.ge.s32.totalorder %s24_s12, 2  ;;  %p142_p2 = scmp.lt.s32.totalorder %s363_s11, 3 }
   0x5   : > { %s420_s12 = smov (%p26_p1, %s24_s12), 0  ;;  %p143_p3 = pnand %p306_p0, %p142_p2 }
   0x6   : > { %p173_p4 = scmp.lt.s32.totalorder (!%p143_p3), %s355_s9, 1  ;;  %v365_v3 = vmov (!%p143_p3), 0.0  }
   0x7   : > { %146 = sbr.rel (%p143_p3) target bundleno = 38 (0x26), region = 28 }
   0xe   : > { %s422_s9 = smov (!%p173_p4, %s355_s9), 1 }
   0xf   : > { %s313_s13 = smul.u32 24, %s422_s9  ;;  %s307_s14 = sshll.u32 %s422_s9, 3 }
  0x10   : > { %s179_s17 = scalar_lea.vmem %s414_s0, %s307_s14  ;;  %s186_s20 = scalar_lea.vmem %s415_s1, %s307_s14 }
  0x11   : > { %v199_v0 = vld [vmem:[%s179_s17] sm:$0xff]  ;;  %s191_s23 = scalar_lea.vmem %s416_s2, %s313_s13 }
  0x12   : > { %v204_v1 = vld [vmem:[%s186_s20] sm:$0xff]  ;;  %v200_v2 = vmul.f32 0.5, %v199_v0 }
  0x13   : > { %vm205_vm0 = vcmp.eq.s32.totalorder %v204_v1, 1 }
  0x14   : > { %v310_v4 = vsel %vm205_vm0, 1.0, %v365_v3  ;;  %339 = vtanh.f32 %v200_v2 }
  0x15   : > { %220 = vst [vmem:[%s191_s23 + $0x10] sm:$0xff] %v310_v4 }
  0x1e   : > { %v340_v5 = vpop.eup %339 }
  0x1f   : > { %v202_v6 = vmul.f32 0.5, %v340_v5 }
  0x21   : > { %v203_v7 = vadd.f32 0.5, %v202_v6 }
  0x23   : > { %v213_v8 = vmul.f32 %v310_v4, %v203_v7  ;;  %211 = vst [vmem:[%s191_s23] sm:$0xff] %v203_v7 }
  0x25   : > { %216 = vst [vmem:[%s191_s23 + $0x8] sm:$0xff] %v213_v8 }
  0x26 PF: > { %s12_s11 = sadd.s32 1, %s363_s11   ;;  %s417_s9 = smov %s359_s10 }
  0x27   : > { %p9_p5 = scmp.ge.s32.totalorder %s12_s11, 4   ;;  %s418_s10 = smov %s420_s12 }
  0x29   :  { %11 = sbr.rel (!%p9_p5) target bundleno = 2 (0x2), region = 65 }

</bundles_post_ra>
